<compile_context>
chip_gen: v6e
topology: v6e:2x2x1
jax: 0.10.0
libtpu: 0.0.40
codegen_flags: <defaults>
</compile_context>

<pallas_src>
import functools

import jax
import jax.numpy as jnp
from jax.experimental import pallas as pl
from jax.experimental.pallas import tpu as pltpu

EPSILON = 1e-4  # module's self.epsilon


def _protopool_dist_kernel(x_ref, proto_ref, p2_ref,          # inputs
                           dist_ref, min_ref, sum_ref):       # outputs
    """Per-batch L2 "convolution" distances + in-VMEM min / sum pooling.

    Block shapes (grid over B, all float32):
      x_ref:    (1, C, HW)   conv features for one batch element (NCHW reshape)
      proto_ref:(P, C)       prototype vectors (1x1 kernels)
      p2_ref:   (P, 1)       precomputed sum(proto^2) per prototype
      dist_ref: (1, P, HW)   distances in the final PyTorch orientation
      min_ref:  (1, P, 1)    min over HW
      sum_ref:  (1, P, 1)    sum over HW (scaled to mean in the epilogue)
    """
    xb = x_ref[0]                                               # (C, HW)
    proto = proto_ref[...]                                      # (P, C)
    p2 = p2_ref[...]                                            # (P, 1)

    x2 = jnp.sum(xb * xb, axis=0, keepdims=True)                # (1, HW)
    xp = jnp.dot(proto, xb, preferred_element_type=jnp.float32)  # (P, HW)
    dist = jnp.maximum(x2 - 2.0 * xp + p2, 0.0)                 # (P, HW)

    dist_ref[0] = dist
    min_ref[0] = jnp.min(dist, axis=-1, keepdims=True)          # (P, 1)
    sum_ref[0] = jnp.sum(dist, axis=-1, keepdims=True)          # (P, 1)


def _protopool_epilogue_kernel(min_ref, avgsum_ref, pp_ref, wT_ref,  # inputs
                               logits_ref, pp_sm_ref,                # outputs
                               *, inv_hw):
    """Tiny tail, run once: softmax(proto_presence), distance mixing,
    log-similarity, focal difference, last (bias-free) linear layer.

    Shapes (all float32):
      min_ref:    (B, P)     avgsum_ref: (B, P)
      pp_ref:     (P, CN)    wT_ref:     (CN, NC)
      logits_ref: (B, NC)    pp_sm_ref:  (P, CN)
    """
    # softmax over the prototype axis (axis 0 of the (P, CN) layout)
    pp = pp_ref[...]
    pp_max = jnp.max(pp, axis=0, keepdims=True)
    pp_exp = jnp.exp(pp - pp_max)
    pp_sm = pp_exp / jnp.sum(pp_exp, axis=0, keepdims=True)
    pp_sm_ref[...] = pp_sm

    min_d = min_ref[...]                                        # (B, P)
    avg_d = avgsum_ref[...] * inv_hw                            # (B, P)

    # mix distances with prototype presence: einsum('bp,cpn->bcn') flattened
    min_mixed = jnp.dot(min_d, pp_sm, preferred_element_type=jnp.float32)
    avg_mixed = jnp.dot(avg_d, pp_sm, preferred_element_type=jnp.float32)

    # distance -> similarity ('log' activation) and focal-style difference
    sim_min = jnp.log((min_mixed + 1.0) / (min_mixed + EPSILON))
    sim_avg = jnp.log((avg_mixed + 1.0) / (avg_mixed + EPSILON))
    x_head = sim_min - sim_avg                                  # (B, CN)

    # last layer (Linear, bias=False)
    logits_ref[...] = jnp.dot(x_head, wT_ref[...],
                              preferred_element_type=jnp.float32)


@jax.jit
def protopool_head_forward(conv_features, prototype_vectors, proto_presence,
                           last_layer_w):
    """Pallas-backed equivalent of ProtoPool_head.forward(conv_features, 0).

    Args:
      conv_features:     (B, C, H, W) float32, NCHW (PyTorch convention)
      prototype_vectors: (P, C, 1, 1) float32
      proto_presence:    (num_classes, P, num_descriptive) float32
      last_layer_w:      (num_classes, num_descriptive*num_classes) float32

    Returns: (distances, logits, min_distances, None, proto_presence_softmax)
    """
    B, C, H, W = conv_features.shape
    P = prototype_vectors.shape[0]
    num_classes, _, num_desc = proto_presence.shape
    HW = H * W
    CN = num_classes * num_desc

    # glue: pure reshapes + tiny-tensor permutes only (no big-tensor transposes)
    x = conv_features.reshape(B, C, HW)                          # (B, C, HW)
    proto = prototype_vectors.reshape(P, C)                      # (P, C)
    p2 = jnp.sum(proto * proto, axis=1, keepdims=True)           # (P, 1) hoisted
    pp2d = jnp.transpose(proto_presence, (1, 0, 2)).reshape(P, CN)
    wT = last_layer_w.T                                          # (CN, NC)

    # ---- main kernel: distances + pooling, gridded & parallel over B ----
    dist_bphw, min_col, sum_col = pl.pallas_call(
        _protopool_dist_kernel,
        grid=(B,),
        out_shape=(
            jax.ShapeDtypeStruct((B, P, HW), jnp.float32),       # distances
            jax.ShapeDtypeStruct((B, P, 1), jnp.float32),        # min over HW
            jax.ShapeDtypeStruct((B, P, 1), jnp.float32),        # sum over HW
        ),
        in_specs=[
            pl.BlockSpec((1, C, HW), lambda b: (b, 0, 0)),       # x
            pl.BlockSpec((P, C), lambda b: (0, 0)),              # prototypes
            pl.BlockSpec((P, 1), lambda b: (0, 0)),              # p2
        ],
        out_specs=(
            pl.BlockSpec((1, P, HW), lambda b: (b, 0, 0)),
            pl.BlockSpec((1, P, 1), lambda b: (b, 0, 0)),
            pl.BlockSpec((1, P, 1), lambda b: (b, 0, 0)),
        ),
        compiler_params=pltpu.CompilerParams(
            dimension_semantics=("parallel",)),
    )(x, proto, p2)

    min_d = min_col.reshape(B, P)
    avg_sum = sum_col.reshape(B, P)

    # ---- epilogue kernel: softmax / mixing / similarity / last layer ----
    vmem = pl.BlockSpec(memory_space=pltpu.MemorySpace.VMEM)
    logits, pp_sm2d = pl.pallas_call(
        functools.partial(_protopool_epilogue_kernel, inv_hw=1.0 / HW),
        out_shape=(
            jax.ShapeDtypeStruct((B, num_classes), jnp.float32),
            jax.ShapeDtypeStruct((P, CN), jnp.float32),
        ),
        in_specs=[vmem, vmem, vmem, vmem],
        out_specs=(vmem, vmem),
    )(min_d, avg_sum, pp2d, wT)

    # glue back to PyTorch shapes (big tensor: reshape only, no transpose)
    distances = dist_bphw.reshape(B, P, H, W)
    proto_presence_sm = jnp.transpose(
        pp_sm2d.reshape(P, num_classes, num_desc), (1, 0, 2))
    return distances, logits, min_d, None, proto_presence_sm


def _reference_forward(conv_features, prototype_vectors, proto_presence,
                       last_layer_w):
    """Pure-jnp reference mirroring the PyTorch forward (gumbel_scale=0)."""
    B, C, H, W = conv_features.shape
    P = prototype_vectors.shape[0]
    pp = jax.nn.softmax(proto_presence, axis=1)
    x = conv_features.reshape(B, C, H * W)
    proto = prototype_vectors.reshape(P, C)
    x2 = jnp.sum(x * x, axis=1, keepdims=True)                   # (B, 1, HW)
    xp = jnp.einsum('bch,pc->bph', x, proto)                     # (B, P, HW)
    p2 = jnp.sum(proto * proto, axis=-1)                         # (P,)
    dist = jnp.maximum(x2 - 2.0 * xp + p2[None, :, None], 0.0)   # (B, P, HW)
    min_d = dist.min(axis=-1)
    avg_d = dist.mean(axis=-1)
    min_mix = jnp.einsum('bp,cpn->bcn', min_d, pp)
    avg_mix = jnp.einsum('bp,cpn->bcn', avg_d, pp)
    sim = lambda d: jnp.log((d + 1.0) / (d + EPSILON))
    x_head = (sim(min_mix) - sim(avg_mix)).reshape(B, -1)
    logits = x_head @ last_layer_w.T
    return dist.reshape(B, P, H, W), logits, min_d, pp


if __name__ == "__main__":
    # small, module-consistent shapes
    B, C, H, W = 2, 32, 8, 8            # conv feature map (NCHW)
    num_prototypes = 16
    num_descriptive = 3
    num_classes = 4
    prototype_shape = (num_prototypes, C, 1, 1)

    key = jax.random.PRNGKey(0)
    k_proto, k_pres, k_x = jax.random.split(key, 3)

    # prototype_vectors ~ torch.rand(prototype_shape)  -> U[0,1)
    prototype_vectors = jax.random.uniform(k_proto, prototype_shape,
                                           dtype=jnp.float32)
    # proto_presence ~ xavier_normal_ on (num_classes, P, num_descriptive)
    fan_in = num_prototypes * num_descriptive
    fan_out = num_classes * num_descriptive
    xav_std = (2.0 / (fan_in + fan_out)) ** 0.5
    proto_presence = xav_std * jax.random.normal(
        k_pres, (num_classes, num_prototypes, num_descriptive),
        dtype=jnp.float32)
    # last layer weight from set_last_layer_incorrect_connection:
    # correct-class connections = 1, incorrect = 0
    col_class = jnp.arange(num_descriptive * num_classes) // num_descriptive
    last_layer_w = (col_class[None, :] ==
                    jnp.arange(num_classes)[:, None]).astype(jnp.float32)

    conv_features = jax.random.uniform(k_x, (B, C, H, W), dtype=jnp.float32)

    outs = protopool_head_forward(conv_features, prototype_vectors,
                                  proto_presence, last_layer_w)
    distances, logits, min_distances, _none, pp_sm = jax.block_until_ready(outs)

    # correctness check against a pure-jnp reference of the same math
    ref_dist, ref_logits, ref_min, ref_pp = _reference_forward(
        conv_features, prototype_vectors, proto_presence, last_layer_w)
    assert distances.shape == (B, num_prototypes, H, W)
    assert logits.shape == (B, num_classes)
    assert min_distances.shape == (B, num_prototypes)
    assert pp_sm.shape == (num_classes, num_prototypes, num_descriptive)
    assert jnp.allclose(distances, ref_dist, atol=1e-3, rtol=1e-3)
    assert jnp.allclose(min_distances, ref_min, atol=1e-3, rtol=1e-3)
    assert jnp.allclose(pp_sm, ref_pp, atol=1e-5, rtol=1e-5)
    assert jnp.allclose(logits, ref_logits, atol=1e-3, rtol=1e-3)

    print("KERNEL_OK")
</pallas_src>

<mosaic_0001>
module attributes {stable_mosaic.version = 11 : i64} {
  func.func @_protopool_dist_kernel(%arg0: i32, %arg1: memref<1x32x64xf32, #tpu.memory_space<vmem>>, %arg2: memref<16x32xf32, #tpu.memory_space<vmem>>, %arg3: memref<16x1xf32, #tpu.memory_space<vmem>>, %arg4: memref<1x16x64xf32, #tpu.memory_space<vmem>>, %arg5: memref<1x16x1xf32, #tpu.memory_space<vmem>>, %arg6: memref<1x16x1xf32, #tpu.memory_space<vmem>>) attributes {dimension_semantics = [#tpu.dimension_semantics<parallel>], iteration_bounds = array<i64: 2>, scalar_prefetch = 0 : i64, scratch_operands = 0 : i64, tpu.core_type = #tpu.core_type<tc>, window_params = [{transform_indices = @transform_0, window_bounds = array<i64: 1, 32, 64>}, {pipeline_mode = #tpu.pipeline_mode<synchronous>, transform_indices = @transform_1, window_bounds = array<i64: 16, 32>}, {pipeline_mode = #tpu.pipeline_mode<synchronous>, transform_indices = @transform_2, window_bounds = array<i64: 16, 1>}, {transform_indices = @transform_3, window_bounds = array<i64: 1, 16, 64>}, {transform_indices = @transform_4, window_bounds = array<i64: 1, 16, 1>}, {transform_indices = @transform_5, window_bounds = array<i64: 1, 16, 1>}]} {
    %c0 = arith.constant 0 : index
    %c0_0 = arith.constant 0 : index
    %c0_1 = arith.constant 0 : index
    %0 = vector.load %arg1[%c0, %c0_0, %c0_1] : memref<1x32x64xf32, #tpu.memory_space<vmem>>, vector<1x32x64xf32>
    %1 = vector.shape_cast %0 : vector<1x32x64xf32> to vector<32x64xf32>
    %c0_2 = arith.constant 0 : index
    %c0_3 = arith.constant 0 : index
    %2 = vector.load %arg2[%c0_2, %c0_3] : memref<16x32xf32, #tpu.memory_space<vmem>>, vector<16x32xf32>
    %c0_4 = arith.constant 0 : index
    %c0_5 = arith.constant 0 : index
    %3 = vector.load %arg3[%c0_4, %c0_5] : memref<16x1xf32, #tpu.memory_space<vmem>>, vector<16x1xf32>
    %4 = arith.mulf %1, %1 : vector<32x64xf32>
    %cst = arith.constant dense<0.000000e+00> : vector<64xf32>
    %5 = vector.multi_reduction <add>, %4, %cst [0] : vector<32x64xf32> to vector<64xf32>
    %6 = vector.shape_cast %5 : vector<64xf32> to vector<1x64xf32>
    %cst_6 = arith.constant dense<0.000000e+00> : vector<16x64xf32>
    %7 = tpu.matmul %2, %1, %cst_6 {dimension_numbers = #tpu.dot_dimension_numbers<[1], [0], [0], [1], [0, 0, 1, 1], [], []>} : vector<16x32xf32>, vector<32x64xf32>, vector<16x64xf32> -> vector<16x64xf32>
    %cst_7 = arith.constant 2.000000e+00 : f32
    %8 = vector.broadcast %cst_7 : f32 to vector<16x64xf32>
    %9 = arith.mulf %8, %7 : vector<16x64xf32>
    %10 = vector.broadcast %6 : vector<1x64xf32> to vector<16x64xf32>
    %11 = arith.subf %10, %9 : vector<16x64xf32>
    %12 = vector.broadcast %3 : vector<16x1xf32> to vector<16x64xf32>
    %13 = arith.addf %11, %12 : vector<16x64xf32>
    %cst_8 = arith.constant 0.000000e+00 : f32
    %14 = vector.broadcast %cst_8 : f32 to vector<16x64xf32>
    %15 = arith.maximumf %13, %14 : vector<16x64xf32>
    %c0_9 = arith.constant 0 : index
    %c0_10 = arith.constant 0 : index
    %c0_11 = arith.constant 0 : index
    %16 = vector.load %arg4[%c0_9, %c0_10, %c0_11] : memref<1x16x64xf32, #tpu.memory_space<vmem>>, vector<1x16x64xf32>
    %17 = vector.shape_cast %16 : vector<1x16x64xf32> to vector<16x64xf32>
    %18 = vector.shape_cast %15 : vector<16x64xf32> to vector<1x16x64xf32>
    tpu.vector_store %arg4[%c0_9, %c0_10, %c0_11], %18 {strides = array<i32>} : memref<1x16x64xf32, #tpu.memory_space<vmem>>, vector<1x16x64xf32>,
    %cst_12 = arith.constant dense<0x7F800000> : vector<16xf32>
    %19 = vector.multi_reduction <minimumf>, %15, %cst_12 [1] : vector<16x64xf32> to vector<16xf32>
    %20 = vector.shape_cast %19 : vector<16xf32> to vector<16x1xf32>
    %c0_13 = arith.constant 0 : index
    %c0_14 = arith.constant 0 : index
    %c0_15 = arith.constant 0 : index
    %21 = vector.load %arg5[%c0_13, %c0_14, %c0_15] : memref<1x16x1xf32, #tpu.memory_space<vmem>>, vector<1x16x1xf32>
    %22 = vector.shape_cast %21 : vector<1x16x1xf32> to vector<16x1xf32>
    %23 = vector.shape_cast %20 : vector<16x1xf32> to vector<1x16x1xf32>
    tpu.vector_store %arg5[%c0_13, %c0_14, %c0_15], %23 {strides = array<i32>} : memref<1x16x1xf32, #tpu.memory_space<vmem>>, vector<1x16x1xf32>,
    %cst_16 = arith.constant dense<0.000000e+00> : vector<16xf32>
    %24 = vector.multi_reduction <add>, %15, %cst_16 [1] : vector<16x64xf32> to vector<16xf32>
    %25 = vector.shape_cast %24 : vector<16xf32> to vector<16x1xf32>
    %c0_17 = arith.constant 0 : index
    %c0_18 = arith.constant 0 : index
    %c0_19 = arith.constant 0 : index
    %26 = vector.load %arg6[%c0_17, %c0_18, %c0_19] : memref<1x16x1xf32, #tpu.memory_space<vmem>>, vector<1x16x1xf32>
    %27 = vector.shape_cast %26 : vector<1x16x1xf32> to vector<16x1xf32>
    %28 = vector.shape_cast %25 : vector<16x1xf32> to vector<1x16x1xf32>
    tpu.vector_store %arg6[%c0_17, %c0_18, %c0_19], %28 {strides = array<i32>} : memref<1x16x1xf32, #tpu.memory_space<vmem>>, vector<1x16x1xf32>,
    return
  }
  func.func @transform_0(%arg0: i32) -> (i32, i32, i32) {
    %c0_i32 = arith.constant 0 : i32
    %c0_i32_0 = arith.constant 0 : i32
    %c0_i32_1 = arith.constant 0 : i32
    return %arg0, %c0_i32, %c0_i32_0 : i32, i32, i32
  }
  func.func @transform_1(%arg0: i32) -> (i32, i32) {
    %c0_i32 = arith.constant 0 : i32
    %c0_i32_0 = arith.constant 0 : i32
    %c0_i32_1 = arith.constant 0 : i32
    return %c0_i32, %c0_i32_0 : i32, i32
  }
  func.func @transform_2(%arg0: i32) -> (i32, i32) {
    %c0_i32 = arith.constant 0 : i32
    %c0_i32_0 = arith.constant 0 : i32
    %c0_i32_1 = arith.constant 0 : i32
    return %c0_i32, %c0_i32_0 : i32, i32
  }
  func.func @transform_3(%arg0: i32) -> (i32, i32, i32) {
    %c0_i32 = arith.constant 0 : i32
    %c0_i32_0 = arith.constant 0 : i32
    %c0_i32_1 = arith.constant 0 : i32
    return %arg0, %c0_i32, %c0_i32_0 : i32, i32, i32
  }
  func.func @transform_4(%arg0: i32) -> (i32, i32, i32) {
    %c0_i32 = arith.constant 0 : i32
    %c0_i32_0 = arith.constant 0 : i32
    %c0_i32_1 = arith.constant 0 : i32
    return %arg0, %c0_i32, %c0_i32_0 : i32, i32, i32
  }
  func.func @transform_5(%arg0: i32) -> (i32, i32, i32) {
    %c0_i32 = arith.constant 0 : i32
    %c0_i32_0 = arith.constant 0 : i32
    %c0_i32_1 = arith.constant 0 : i32
    return %arg0, %c0_i32, %c0_i32_0 : i32, i32, i32
  }
}

module attributes {stable_mosaic.version = 11 : i64} {
  func.func @_protopool_epilogue_kernel(%arg0: memref<2x16xf32, #tpu.memory_space<vmem>>, %arg1: memref<2x16xf32, #tpu.memory_space<vmem>>, %arg2: memref<16x12xf32, #tpu.memory_space<vmem>>, %arg3: memref<12x4xf32, #tpu.memory_space<vmem>>, %arg4: memref<2x4xf32, #tpu.memory_space<vmem>>, %arg5: memref<16x12xf32, #tpu.memory_space<vmem>>) attributes {dimension_semantics = [], scalar_prefetch = 0 : i64, scratch_operands = 0 : i64, tpu.core_type = #tpu.core_type<tc>} {
    %c0 = arith.constant 0 : index
    %c0_0 = arith.constant 0 : index
    %0 = vector.load %arg2[%c0, %c0_0] : memref<16x12xf32, #tpu.memory_space<vmem>>, vector<16x12xf32>
    %cst = arith.constant dense<0xFF800000> : vector<12xf32>
    %1 = vector.multi_reduction <maximumf>, %0, %cst [0] : vector<16x12xf32> to vector<12xf32>
    %2 = vector.shape_cast %1 : vector<12xf32> to vector<1x12xf32>
    %3 = vector.broadcast %2 : vector<1x12xf32> to vector<16x12xf32>
    %4 = arith.subf %0, %3 : vector<16x12xf32>
    %5 = math.exp %4 : vector<16x12xf32>
    %cst_1 = arith.constant dense<0.000000e+00> : vector<12xf32>
    %6 = vector.multi_reduction <add>, %5, %cst_1 [0] : vector<16x12xf32> to vector<12xf32>
    %7 = vector.shape_cast %6 : vector<12xf32> to vector<1x12xf32>
    %8 = vector.broadcast %7 : vector<1x12xf32> to vector<16x12xf32>
    %9 = arith.divf %5, %8 : vector<16x12xf32>
    %c0_2 = arith.constant 0 : index
    %c0_3 = arith.constant 0 : index
    %10 = vector.load %arg5[%c0_2, %c0_3] : memref<16x12xf32, #tpu.memory_space<vmem>>, vector<16x12xf32>
    tpu.vector_store %arg5[%c0_2, %c0_3], %9 {strides = array<i32>} : memref<16x12xf32, #tpu.memory_space<vmem>>, vector<16x12xf32>,
    %c0_4 = arith.constant 0 : index
    %c0_5 = arith.constant 0 : index
    %11 = vector.load %arg0[%c0_4, %c0_5] : memref<2x16xf32, #tpu.memory_space<vmem>>, vector<2x16xf32>
    %c0_6 = arith.constant 0 : index
    %c0_7 = arith.constant 0 : index
    %12 = vector.load %arg1[%c0_6, %c0_7] : memref<2x16xf32, #tpu.memory_space<vmem>>, vector<2x16xf32>
    %cst_8 = arith.constant 1.562500e-02 : f32
    %13 = vector.broadcast %cst_8 : f32 to vector<2x16xf32>
    %14 = arith.mulf %12, %13 : vector<2x16xf32>
    %cst_9 = arith.constant dense<0.000000e+00> : vector<2x12xf32>
    %15 = tpu.matmul %11, %9, %cst_9 {dimension_numbers = #tpu.dot_dimension_numbers<[1], [0], [0], [1], [0, 0, 1, 1], [], []>} : vector<2x16xf32>, vector<16x12xf32>, vector<2x12xf32> -> vector<2x12xf32>
    %cst_10 = arith.constant dense<0.000000e+00> : vector<2x12xf32>
    %16 = tpu.matmul %14, %9, %cst_10 {dimension_numbers = #tpu.dot_dimension_numbers<[1], [0], [0], [1], [0, 0, 1, 1], [], []>} : vector<2x16xf32>, vector<16x12xf32>, vector<2x12xf32> -> vector<2x12xf32>
    %cst_11 = arith.constant 1.000000e+00 : f32
    %17 = vector.broadcast %cst_11 : f32 to vector<2x12xf32>
    %18 = arith.addf %15, %17 : vector<2x12xf32>
    %cst_12 = arith.constant 9.99999974E-5 : f32
    %19 = vector.broadcast %cst_12 : f32 to vector<2x12xf32>
    %20 = arith.addf %15, %19 : vector<2x12xf32>
    %21 = arith.divf %18, %20 : vector<2x12xf32>
    %22 = math.log %21 : vector<2x12xf32>
    %cst_13 = arith.constant 1.000000e+00 : f32
    %23 = vector.broadcast %cst_13 : f32 to vector<2x12xf32>
    %24 = arith.addf %16, %23 : vector<2x12xf32>
    %cst_14 = arith.constant 9.99999974E-5 : f32
    %25 = vector.broadcast %cst_14 : f32 to vector<2x12xf32>
    %26 = arith.addf %16, %25 : vector<2x12xf32>
    %27 = arith.divf %24, %26 : vector<2x12xf32>
    %28 = math.log %27 : vector<2x12xf32>
    %29 = arith.subf %22, %28 : vector<2x12xf32>
    %c0_15 = arith.constant 0 : index
    %c0_16 = arith.constant 0 : index
    %30 = vector.load %arg3[%c0_15, %c0_16] : memref<12x4xf32, #tpu.memory_space<vmem>>, vector<12x4xf32>
    %cst_17 = arith.constant dense<0.000000e+00> : vector<2x4xf32>
    %31 = tpu.matmul %29, %30, %cst_17 {dimension_numbers = #tpu.dot_dimension_numbers<[1], [0], [0], [1], [0, 0, 1, 1], [], []>} : vector<2x12xf32>, vector<12x4xf32>, vector<2x4xf32> -> vector<2x4xf32>
    %c0_18 = arith.constant 0 : index
    %c0_19 = arith.constant 0 : index
    %32 = vector.load %arg4[%c0_18, %c0_19] : memref<2x4xf32, #tpu.memory_space<vmem>>, vector<2x4xf32>
    tpu.vector_store %arg4[%c0_18, %c0_19], %31 {strides = array<i32>} : memref<2x4xf32, #tpu.memory_space<vmem>>, vector<2x4xf32>,
    return
  }
}

</mosaic_0001>

<bundles_post_ra>
// kernel: protopool_head_forward.2
= control target key start
LH: loop header
LB: loop body
LE: loop exit
PB: predicated region body
PF: predicated region fallthrough
CT: control target
= control target key end

     0   :  { %s603_s18 = smov 0   ;;  %s654_s0 = inlined_call_operand.vmem [shape: f32[2,32,64], index: 0, kind: input, shape index: {}]   ;;  %s655_s1 = inlined_call_operand.vmem [shape: f32[16,32], index: 1, kind: input, shape index: {}]   ;;  %s656_s2 = inlined_call_operand.vmem [shape: f32[16,1], index: 2, kind: input, shape index: {}]   ;;  %s657_s3 = inlined_call_operand.vmem [shape: f32[2,16,64], index: 3, kind: output, shape index: {0}]   ;;  %s658_s4 = inlined_call_operand.vmem [shape: f32[2,16,1], index: 4, kind: output, shape index: {1}]   ;;  %s659_s5 = inlined_call_operand.vmem [shape: f32[2,16,1], index: 5, kind: output, shape index: {2}]  }
   0x1 LB: > { %s516_s19 = sadd.s32 4294967295, %s570_s18   ;;  %p520_p0 = scmp.ge.s32.totalorder %s570_s18, 1  ;;  %s570_s18 = sphi %s603_s18, %s16_s18  }
   0x2   : > { %p192_p1 = scmp.lt.s32.totalorder %s570_s18, 3 }
   0x4   : > { %p193_p2 = pnand %p520_p0, %p192_p1 }
   0x5   : > { %p230_p3 = scmp.lt.s32.totalorder (!%p193_p2), %s516_s19, 1 }
   0x6   : > { %196 = sbr.rel (%p193_p2) target bundleno = 372 (0x174), region = 32 }
   0xb   : > { %v254_v0 = vld [vmem:[%s655_s1] sm:$0xff]  ;;  %vm276_vm0 = vcmask 261120   ;;  %v572_v1 = vmov 0   ;;  %s661_s19 = smov (!%p230_p3, %s516_s19), 1  ;;  %v257_v3 = vld [vmem:[%s656_s2 + $0x8] sm:$0xff]  ;;  %vm262_vm1 = vcmask 523264  }
   0xc   : > { %551 = vmatprep.mubr.msk.f32.mxu0 %vm276_vm0, %v254_v0  ;;  %563 = vset.pattern.permute.xlu0 %v572_v1  ;;  %v256_v2 = vld [vmem:[%s656_s2] sm:$0xff]  ;;  %s533_s26 = sshll.u32 %s661_s19, 5  ;;  %v255_v17 = vld [vmem:[%s655_s1 + $0x8] sm:$0xff]  ;;  %s534_s7 = sshll.u32 %s661_s19, 4  ;;  %vm384_vm2 = vcmask 7168  }
   0xd   : > { %364 = vperm.xlu0 %563, %v256_v2   ;;  %s234_s29 = scalar_lea.vmem %s654_s0, %s533_s26  ;;  %s239_s10 = scalar_lea.vmem %s657_s3, %s534_s7 }
   0xe   : > { %v253_v4 = vld [vmem:[%s234_s29 + $0x18] sm:$0xff]  ;;  %v252_v5 = vld [vmem:[%s234_s29 + $0x10] sm:$0xff]  ;;  %v251_v6 = vld [vmem:[%s234_s29 + $0x8] sm:$0xff]  ;;  %s244_s13 = scalar_lea.vmem %s658_s4, %s534_s7  ;;  %s249_s16 = scalar_lea.vmem %s659_s5, %s534_s7 }
   0xf   : > { %543 = vmatprep.subr.mxu0 %v253_v4  ;;  %v260_v7 = vmul.f32 %v252_v5, %v252_v5  ;;  %v259_v8 = vmul.f32 %v251_v6, %v251_v6  ;;  %v250_v9 = vld [vmem:[%s234_s29] sm:$0xff]  ;;  %v261_v10 = vmul.f32 %v253_v4, %v253_v4 }
  0x10   : > { %544 = vmatpush3.msra.mxu0 %v253_v4  ;;  %v258_v11 = vmul.f32 %v250_v9, %v250_v9 }
  0x11   : > { %369 = vperm.xlu0 %563, %v257_v3   ;;  %545 = vmatprep.subr.mxu0 %v252_v5  ;;  %v264_v12 = vsel %vm262_vm1, %v259_v8, 0.0  ;;  %v266_v13 = vsel %vm262_vm1, %v260_v7, 0.0  ;;  %v268_v16 = vsel %vm262_vm1, %v261_v10, 0.0 }
  0x12   : > { %546 = vmatpush3.msra.mxu0 %v252_v5  ;;  %v263_v14 = vsel %vm262_vm1, %v258_v11, 0.0 }
  0x13   : > { %547 = vmatprep.subr.mxu0 %v251_v6  ;;  %v265_v15 = vadd.f32 %v264_v12, %v263_v14 }
  0x14   : > { %548 = vmatpush3.msra.mxu0 %v251_v6 }
  0x15   : > { %v267_v18 = vadd.f32 %v266_v13, %v265_v15  ;;  %549 = vmatprep.subr.mxu0 %v250_v9 }
  0x16   : > { %550 = vmatpush3.msra.mxu0 %v250_v9 }
  0x17   : > { %552 = vmatmul.mubr.msk.f32.vlgmr.msra.gmra.mxu0 %vm276_vm0, %v255_v17  ;;  %v269_v19 = vadd.f32 %v268_v16, %v267_v18 }
  0x19   : > { %v270_v20 = vrot.slane %v269_v19, 4 }
  0x1b   : > { %v271_v21 = vadd.f32 %v270_v20, %v269_v19 }
  0x1d   : > { %v272_v22 = vrot.slane %v271_v21, 2 }
  0x1f   : > { %v273_v23 = vadd.f32 %v272_v22, %v271_v21 }
  0x21   : > { %v274_v24 = vrot.slane %v273_v23, 1 }
  0x23   : > { %v275_v26 = vadd.f32 %v274_v24, %v273_v23 }
  0x88   : > { %v365_v25 = vpop.permute.xlu0 %364 }
  0x8c   : > { %v370_v32 = vpop.permute.xlu0 %369 }
  0xd7   : > { %v553_v27 = vpop.f32.mrf.mxu0 }
  0xd8   : > { %v359_v28 = vmul.f32 2.0, %v553_v27 }
  0xd9   : > { %v349_v29 = vpop.f32.mrf.mxu0 }
  0xda   : > { %v361_v30 = vsub.f32 %v275_v26, %v359_v28  ;;  %v358_v31 = vmul.f32 2.0, %v349_v29 }
  0xdc   : > { %v373_v33 = vadd.f32 %v370_v32, %v361_v30  ;;  %v360_v34 = vsub.f32 %v275_v26, %v358_v31 }
  0xde   : > { %v372_v35 = vadd.f32 %v365_v25, %v360_v34  ;;  %v375_v36 = vmax.f32 %v373_v33, 0.0 }
  0xe0   : > { %v374_v37 = vmax.f32 %v372_v35, 0.0  ;;  %v381_v38 = vsel %vm262_vm1, %v375_v36, inf  ;;  %377 = vst.msk [vmem:[%s239_s10 + $0x8] sm:$0xff] %vm262_vm1, %v375_v36  ;;  %v390_v41 = vsel %vm262_vm1, %v375_v36, 0.0 }
  0xe1   : > { %382 = vmin.xlane.f32.xlu1 %v381_v38 }
  0xe2   : > { %v387_v39 = vsel %vm262_vm1, %v374_v37, 0.0  ;;  %376 = vst.msk [vmem:[%s239_s10] sm:$0xff] %vm262_vm1, %v374_v37  ;;  %v378_v40 = vsel %vm262_vm1, %v374_v37, inf }
  0xe3   : > { %388 = vadd.xlane.f32.xlu0 %v387_v39 }
  0xe5   : > { %379 = vmin.xlane.f32.xlu1 %v378_v40 }
  0xe9   : > { %391 = vadd.xlane.f32.xlu1 %v390_v41 }
 0x16a   : > { %v383_v42 = vpop.xlane.xlu1 %382 }
 0x16b   : > { %386 = vst.msk [vmem:[%s244_s13 + $0x8] sm:$0xff] %vm384_vm2, %v383_v42 }
 0x16c   : > { %v389_v43 = vpop.xlane.xlu0 %388 }
 0x16d   : > { %393 = vst.msk [vmem:[%s249_s16] sm:$0xff] %vm384_vm2, %v389_v43 }
 0x16e   : > { %v380_v44 = vpop.xlane.xlu1 %379 }
 0x16f   : > { %385 = vst.msk [vmem:[%s244_s13] sm:$0xff] %vm384_vm2, %v380_v44 }
 0x172   : > { %v392_v45 = vpop.xlane.xlu1 %391 }
 0x173   : > { %394 = vst.msk [vmem:[%s249_s16 + $0x8] sm:$0xff] %vm384_vm2, %v392_v45 }
 0x174 PF: > { %s16_s18 = sadd.s32 1, %s570_s18  }
 0x175   : > { %p13_p4 = scmp.ge.s32.totalorder %s16_s18, 4  }
 0x177   :  { %15 = sbr.rel (!%p13_p4) target bundleno = 1 (0x1), region = 86 }

// kernel: protopool_head_forward.3
= control target key start
LH: loop header
LB: loop body
LE: loop exit
PB: predicated region body
PF: predicated region fallthrough
CT: control target
= control target key end

     0   :  { %vm22_vm0 = vcmask 97280   ;;  %v387_v2 = vmov 0.0   ;;  %vm388_vm1 = vmmov 0   ;;  %s457_s0 = inlined_call_operand.vmem [shape: f32[2,16], index: 0, kind: input, shape index: {}]   ;;  %s458_s1 = inlined_call_operand.vmem [shape: f32[2,16], index: 1, kind: input, shape index: {}]   ;;  %s459_s2 = inlined_call_operand.vmem [shape: f32[16,12], index: 2, kind: input, shape index: {}]   ;;  %s460_s3 = inlined_call_operand.vmem [shape: f32[12,4], index: 3, kind: input, shape index: {}]   ;;  %s461_s4 = inlined_call_operand.hbm [shape: f32[2,4], index: 4, kind: output, shape index: {0}]   ;;  %s462_s5 = inlined_call_operand.vmem [shape: f32[16,12], index: 5, kind: output, shape index: {1}]  }
   0x1   :  { %v20_v0 = vld [vmem:[%s459_s2] sm:$0xff]  ;;  %v21_v1 = vld [vmem:[%s459_s2 + $0x8] sm:$0xff]  ;;  %327 = vmatprep.subr.mxu0 %v387_v2  ;;  %334 = vmatprep.subr.mxu1 %v387_v2 }
   0x2   :  { %v23_v3 = vsel %vm22_vm0, %v20_v0, -inf  ;;  %v24_v4 = vsel %vm22_vm0, %v21_v1, -inf  ;;  %331 = vmatprep.mubr.msk.f32.mxu0 %vm388_vm1, %v387_v2  ;;  %338 = vmatprep.mubr.msk.f32.mxu1 %vm388_vm1, %v387_v2 }
   0x3   :  { %v25_v5 = vmax.f32 %v23_v3, %v24_v4 }
   0x4   :  { %11 = vsyncpa [#allocation3], 0  ;;  %v53_v27 = vld [vmem:[%s458_s1] sm:$0x3]  ;;  %vm55_vm2 = vcmask 130048   ;;  %vm220_vm3 = vcmask 1043456  }
   0x5   :  { %v26_v6 = vrot.slane %v25_v5, 4  ;;  %v54_v31 = vmul.f32 0.015625, %v53_v27  ;;  %v52_v32 = vld [vmem:[%s457_s0] sm:$0x3]  ;;  %v216_v33 = vld [vmem:[%s460_s3 + $0x8] sm:$0xf] }
   0x6   :  { %v215_v34 = vld [vmem:[%s460_s3] sm:$0xff]  ;;  %s389_s0 = smov [#allocation2]   ;;  %vm294_vm4 = vcmask 25600  }
   0x7   :  { %v27_v7 = vmax.f32 %v25_v5, %v26_v6  ;;  %s302_s3 = sshll.u32 %s389_s0, 4  ;;  %s303_s3 = int_to_ptr.vmem [resolvable:$true] %s302_s3 }
   0x8   :  { %s365_s6 = scalar_lea.vmem %s303_s3, 32  ;;  %p370_p1 = scmp.lt.s32.totalorder %s303_s3, %s303_s3 }
   0x9   :  { %v28_v8 = vrot.slane %v27_v7, 2  ;;  %p366_p0 = scmp.ne.s32.totalorder %s303_s3, %s365_s6  ;;  %p371_p2 = scmp.lt.s32.totalorder %s365_s6, %s365_s6 }
   0xb   :  { %v29_v9 = vmax.f32 %v27_v7, %v28_v8  ;;  %p372_p3 = por %p371_p2, %p370_p1 }
   0xd   :  { %v30_v10 = vrot.slane %v29_v9, 1  ;;  %p373_p4 = pnand %p372_p3, %p366_p0 }
   0xf   :  { %v31_v11 = vmax.f32 %v29_v9, %v30_v10 }
  0x11   :  { %v32_v12 = vsub.f32 %v20_v0, %v31_v11  ;;  %v33_v13 = vsub.f32 %v21_v1, %v31_v11 }
  0x13   :  { %v34_v14 = vmul.f32 1.442695, %v32_v12  ;;  %v36_v15 = vmul.f32 1.442695, %v33_v13 }
  0x15   :  { %351 = vpow2.f32 %v34_v14 }
  0x16   :  { %353 = vpow2.f32 %v36_v15 }
  0x22   :  { %v352_v16 = vpop.eup %351 }
  0x23   :  { %v354_v17 = vpop.eup %353  ;;  %v38_v18 = vsel %vm22_vm0, %v352_v16, 0.0 }
  0x24   :  { %v39_v19 = vsel %vm22_vm0, %v354_v17, 0.0 }
  0x25   :  { %v40_v20 = vadd.f32 %v39_v19, %v38_v18 }
  0x27   :  { %v41_v21 = vrot.slane %v40_v20, 4 }
  0x29   :  { %v42_v22 = vadd.f32 %v41_v21, %v40_v20 }
  0x2b   :  { %v43_v23 = vrot.slane %v42_v22, 2 }
  0x2d   :  { %v44_v24 = vadd.f32 %v43_v23, %v42_v22 }
  0x2f   :  { %v45_v25 = vrot.slane %v44_v24, 1 }
  0x31   :  { %v46_v26 = vadd.f32 %v45_v25, %v44_v24 }
  0x33   :  { %355 = vrcp.f32 %v46_v26 }
  0x40   :  { %v356_v28 = vpop.eup %355 }
  0x41   :  { %v49_v29 = vmul.f32 %v356_v28, %v354_v17  ;;  %v48_v30 = vmul.f32 %v356_v28, %v352_v16 }
  0x43   :  { %51 = vst.msk [vmem:[%s462_s5 + $0x8] sm:$0xff] %vm22_vm0, %v49_v29  ;;  %328 = vmatpush3.msra.mxu0 %v49_v29  ;;  %335 = vmatpush3.msra.mxu1 %v49_v29  ;;  %50 = vst.msk [vmem:[%s462_s5] sm:$0xff] %vm22_vm0, %v48_v30 }
  0x44   :  { %329 = vmatprep.subr.mxu0 %v387_v2  ;;  %336 = vmatprep.subr.mxu1 %v387_v2 }
  0x45   :  { %330 = vmatpush3.msra.mxu0 %v48_v30  ;;  %337 = vmatpush3.msra.mxu1 %v48_v30 }
  0x46   :  { %332 = vmatmul.mubr.msk.f32.vlgmr.msra.gmra.mxu0 %vm55_vm2, %v52_v32  ;;  %339 = vmatmul.mubr.msk.f32.vlgmr.msra.gmra.mxu1 %vm55_vm2, %v54_v31 }
  0x47   :  { %341 = vmatprep.subr.mxu0 %v387_v2  ;;  %345 = vmatprep.mubr.msk.f32.mxu0 %vm388_vm1, %v387_v2 }
  0x48   :  { %342 = vmatpush3.msk.msra.mxu0 %vm220_vm3, %v216_v33 }
  0x49   :  { %343 = vmatprep.subr.mxu0 %v387_v2 }
  0x4a   :  { %344 = vmatpush3.msra.mxu0 %v215_v34 }
 0x106   :  { %v125_v35 = vpop.f32.mrf.mxu0  ;;  %v198_v36 = vpop.f32.mrf.mxu1 }
 0x107   :  { %v203_v37 = vadd.f32 0.0001, %v125_v35  ;;  %v209_v38 = vadd.f32 0.0001, %v198_v36  ;;  %v202_v41 = vadd.f32 1.0, %v125_v35  ;;  %v208_v43 = vadd.f32 1.0, %v198_v36 }
 0x108   :  { %v333_v39 = vpop.f32.mrf.mxu0  ;;  %v340_v40 = vpop.f32.mrf.mxu1 }
 0x109   :  { %357 = vrcp.f32 %v203_v37 }
 0x10a   :  { %359 = vrcp.f32 %v209_v38 }
 0x116   :  { %v358_v42 = vpop.eup %357 }
 0x117   :  { %v360_v44 = vpop.eup %359  ;;  %v205_v45 = vmul.f32 %v358_v42, %v202_v41 }
 0x118   :  { %v211_v46 = vmul.f32 %v360_v44, %v208_v43 }
 0x119   :  { %361 = vlog2.f32 %v205_v45 }
 0x11a   :  { %363 = vlog2.f32 %v211_v46 }
 0x126   :  { %v362_v47 = vpop.eup %361 }
 0x127   :  { %v364_v48 = vpop.eup %363  ;;  %v207_v49 = vmul.f32 0.6931472, %v362_v47 }
 0x128   :  { %v213_v50 = vmul.f32 0.6931472, %v364_v48 }
 0x12a   :  { %v214_v51 = vsub.f32 %v207_v49, %v213_v50 }
 0x12c   :  { %346 = vmatmul.mubr.msk.f32.vlgmr.msra.gmra.mxu0 %vm22_vm0, %v214_v51 }
 0x1ec   :  { %v290_v52 = vpop.f32.mrf.mxu0 }
 0x1ed   :  { %295 = vst.msk [vmem:[#allocation2] sm:$0x3] %vm294_vm4, %v290_v52 }
 0x1ee   :  { %v347_v53 = vpop.f32.mrf.mxu0 }
 0x1ef   :  { %376 = shalt.err (!%p373_p4)
}
 0x1f0   :  { %305 = dma.vmem_to_hbm [thread:$0]  %s303_s3, 32, %s461_s4, [#allocation3]  }
 0x1f1   :  { %385 = dma.done.wait [#allocation3], 32  }
 0x1f2   :  { %386 = vsyncadd [#allocation3], 4294967264 }
 0x1f3   :  { %313 = vsyncpa [#allocation3], 1 }

</bundles_post_ra>
